<compile_context>
chip_gen: v5e
topology: v5e:2x2
jax: 0.10.0
libtpu: 0.0.40
codegen_flags: <defaults>
</compile_context>

<pallas_src>
import jax
import jax.numpy as jnp
from jax import lax
from jax.experimental import pallas as pl
from jax.experimental.pallas import tpu as pltpu

KERNEL_MUL = 2.0
KERNEL_NUM = 5


def _mmd_kernel(src_ref, tgt_ref, out_ref):
    # Native-dtype loads: bf16 inputs go straight to the bf16-native MXU;
    # only the VPU-side intermediates are upcast to f32.
    src = src_ref[...]                          # (B, D)
    tgt = tgt_ref[...]                          # (B, D)
    b = src.shape[0]
    n = 2 * b

    # --- Gram quadrants on the MXU (f32 accumulation) -------------------------
    dims = (((1,), (1,)), ((), ()))
    g_ss = lax.dot_general(src, src, dimension_numbers=dims,
                           preferred_element_type=jnp.float32)   # (B, B)
    g_st = lax.dot_general(src, tgt, dimension_numbers=dims,
                           preferred_element_type=jnp.float32)   # (B, B)
    g_tt = lax.dot_general(tgt, tgt, dimension_numbers=dims,
                           preferred_element_type=jnp.float32)   # (B, B)

    src_f = src.astype(jnp.float32)
    tgt_f = tgt.astype(jnp.float32)
    sq_s = jnp.sum(src_f * src_f, axis=1, keepdims=True)         # (B, 1)
    sq_t = jnp.sum(tgt_f * tgt_f, axis=1, keepdims=True)         # (B, 1)
    sq_s_row = jnp.reshape(sq_s, (1, b))                         # (1, B)
    sq_t_row = jnp.reshape(sq_t, (1, b))                         # (1, B)

    # Pairwise squared distances per quadrant; clamp tiny negatives from
    # Gram-trick cancellation (explicit-diff reference is exactly >= 0).
    l2_ss = jnp.maximum(sq_s + sq_s_row - 2.0 * g_ss, 0.0)
    l2_st = jnp.maximum(sq_s + sq_t_row - 2.0 * g_st, 0.0)
    l2_tt = jnp.maximum(sq_t + sq_t_row - 2.0 * g_tt, 0.0)

    # --- Data-dependent bandwidth: sum over the full (2B,2B) L2 matrix --------
    # The off-diagonal quadrants are transposes of each other -> count l2_st twice.
    l2_total = (jnp.sum(l2_ss, keepdims=True)
                + jnp.sum(l2_tt, keepdims=True)
                + 2.0 * jnp.sum(l2_st, keepdims=True))           # (1, 1)
    bandwidth = l2_total * (1.0 / float(n * n - n))
    bandwidth = bandwidth * (1.0 / (KERNEL_MUL ** (KERNEL_NUM // 2)))

    # --- Multi-scale Gaussian kernel sums --------------------------------------
    if KERNEL_MUL == 2.0:
        # Scales are bw * {1, 2, 4, ..., 2^(K-1)}.  Compute only the *widest*
        # bandwidth term and derive the narrower ones by repeated squaring:
        #   exp(-l2/(bw*2^(K-1)))^(2^j) == exp(-l2/(bw*2^(K-1-j)))
        # -> 1 EUP exp + (K-1) VPU multiplies per element instead of K exps.
        # Hoisted scalar reciprocal: a single (1,1) divide instead of K full
        # (B,B) vector divides.
        neg_inv_widest = -1.0 / (bandwidth * (KERNEL_MUL ** (KERNEL_NUM - 1)))

        def multi_scale_sum(l2):
            e = jnp.exp(l2 * neg_inv_widest)
            acc = e
            for _ in range(KERNEL_NUM - 1):
                e = e * e
                acc = acc + e
            return jnp.sum(acc, keepdims=True)                   # (1, 1)
    else:
        # Generic fallback (still hoists the per-scale scalar reciprocal).
        neg_invs = [-1.0 / (bandwidth * (KERNEL_MUL ** i)) for i in range(KERNEL_NUM)]

        def multi_scale_sum(l2):
            acc = jnp.exp(l2 * neg_invs[0])
            for neg_inv in neg_invs[1:]:
                acc = acc + jnp.exp(l2 * neg_inv)
            return jnp.sum(acc, keepdims=True)                   # (1, 1)

    k_ss = multi_scale_sum(l2_ss)
    k_tt = multi_scale_sum(l2_tt)
    k_st = multi_scale_sum(l2_st)

    # mean(K_xx + K_yy - K_xy - K_yx) over (B,B), with K_yx == K_xy^T.
    out_ref[...] = (k_ss + k_tt - 2.0 * k_st) * (1.0 / float(b * b))


def mmd_loss(source, target):
    """Pallas TPU implementation of MmdLoss.forward(): mmd(source, target) -> f32 scalar."""
    B, D = source.shape
    assert target.shape == (B, D), "source/target must both be (batch, features)"

    # Single-invocation, whole-array-resident design: inputs, 3 Gram blocks,
    # 3 L2 blocks and exp temps all live in VMEM at once.  Keep the footprint
    # well under the smallest default scoped-VMEM budget (16 MiB on v5e).
    vmem_bytes_est = 4 * (2 * B * D + 10 * B * B)
    assert vmem_bytes_est < 12 * (1 << 20), (
        "batch too large for the single-block MMD kernel; row-tile the pairwise "
        "matrix with a two-pass bandwidth computation")
    # TODO(synk): row-tiled two-pass variant (pass 1: accumulate sum(L2) for the
    # bandwidth; pass 2: exp-sum) for large batches / v7x (64 MiB VMEM, 2 TCs).

    out = pl.pallas_call(
        _mmd_kernel,
        out_shape=jax.ShapeDtypeStruct((1, 1), jnp.float32),
        in_specs=[
            pl.BlockSpec(memory_space=pltpu.MemorySpace.VMEM),
            pl.BlockSpec(memory_space=pltpu.MemorySpace.VMEM),
        ],
        out_specs=pl.BlockSpec(memory_space=pltpu.MemorySpace.VMEM),
    )(source, target)
    return out[0, 0]


def _mmd_reference(source, target):
    """Pure-JAX reference mirroring the PyTorch mmd()."""
    total = jnp.concatenate([source.astype(jnp.float32),
                             target.astype(jnp.float32)], axis=0)
    n = total.shape[0]
    b = source.shape[0]
    diff = total[:, None, :] - total[None, :, :]
    l2 = jnp.sum(diff * diff, axis=2)
    bandwidth = jnp.sum(l2) / (n * n - n)
    bandwidth = bandwidth / (KERNEL_MUL ** (KERNEL_NUM // 2))
    kernels = sum(jnp.exp(-l2 / (bandwidth * (KERNEL_MUL ** i)))
                  for i in range(KERNEL_NUM))
    xx = kernels[:b, :b]
    yy = kernels[b:, b:]
    xy = kernels[:b, b:]
    yx = kernels[b:, :b]
    return jnp.mean(xx + yy - xy - yx)


if __name__ == "__main__":
    key = jax.random.PRNGKey(0)
    k_src, k_tgt = jax.random.split(key)
    B, D = 8, 32  # batch of latent vectors, hidden size 32 (LSTM-VAE latent)
    source = jax.random.normal(k_src, (B, D), dtype=jnp.float32)
    target = 0.5 * jax.random.normal(k_tgt, (B, D), dtype=jnp.float32) + 0.25

    # f32 path
    loss = jax.block_until_ready(mmd_loss(source, target))
    ref = jax.block_until_ready(_mmd_reference(source, target))
    assert jnp.isfinite(loss), "non-finite MMD loss"
    assert jnp.allclose(loss, ref, rtol=1e-4, atol=1e-4), (loss, ref)

    # native-bf16 path (inputs feed the MXU without an f32 upcast)
    src_bf = source.astype(jnp.bfloat16)
    tgt_bf = target.astype(jnp.bfloat16)
    loss_bf = jax.block_until_ready(mmd_loss(src_bf, tgt_bf))
    ref_bf = jax.block_until_ready(
        _mmd_reference(src_bf.astype(jnp.float32), tgt_bf.astype(jnp.float32)))
    assert jnp.isfinite(loss_bf), "non-finite bf16 MMD loss"
    assert jnp.allclose(loss_bf, ref_bf, rtol=1e-2, atol=1e-2), (loss_bf, ref_bf)

    print("KERNEL_OK")
</pallas_src>

<mosaic_0001>
module attributes {stable_mosaic.version = 11 : i64} {
  func.func @_mmd_kernel(%arg0: memref<8x32xf32, #tpu.memory_space<vmem>>, %arg1: memref<8x32xf32, #tpu.memory_space<vmem>>, %arg2: memref<1x1xf32, #tpu.memory_space<vmem>>) attributes {dimension_semantics = [], scalar_prefetch = 0 : i64, scratch_operands = 0 : i64, tpu.core_type = #tpu.core_type<tc>} {
    %c0 = arith.constant 0 : index
    %c0_0 = arith.constant 0 : index
    %0 = vector.load %arg0[%c0, %c0_0] : memref<8x32xf32, #tpu.memory_space<vmem>>, vector<8x32xf32>
    %c0_1 = arith.constant 0 : index
    %c0_2 = arith.constant 0 : index
    %1 = vector.load %arg1[%c0_1, %c0_2] : memref<8x32xf32, #tpu.memory_space<vmem>>, vector<8x32xf32>
    %cst = arith.constant dense<0.000000e+00> : vector<8x8xf32>
    %2 = tpu.matmul %0, %0, %cst {dimension_numbers = #tpu.dot_dimension_numbers<[1], [1], [0], [0], [0, 0, 1, 0], [], []>} : vector<8x32xf32>, vector<8x32xf32>, vector<8x8xf32> -> vector<8x8xf32>
    %cst_3 = arith.constant dense<0.000000e+00> : vector<8x8xf32>
    %3 = tpu.matmul %0, %1, %cst_3 {dimension_numbers = #tpu.dot_dimension_numbers<[1], [1], [0], [0], [0, 0, 1, 0], [], []>} : vector<8x32xf32>, vector<8x32xf32>, vector<8x8xf32> -> vector<8x8xf32>
    %cst_4 = arith.constant dense<0.000000e+00> : vector<8x8xf32>
    %4 = tpu.matmul %1, %1, %cst_4 {dimension_numbers = #tpu.dot_dimension_numbers<[1], [1], [0], [0], [0, 0, 1, 0], [], []>} : vector<8x32xf32>, vector<8x32xf32>, vector<8x8xf32> -> vector<8x8xf32>
    %5 = arith.mulf %0, %0 : vector<8x32xf32>
    %cst_5 = arith.constant dense<0.000000e+00> : vector<8xf32>
    %6 = vector.multi_reduction <add>, %5, %cst_5 [1] : vector<8x32xf32> to vector<8xf32>
    %7 = vector.shape_cast %6 : vector<8xf32> to vector<8x1xf32>
    %8 = arith.mulf %1, %1 : vector<8x32xf32>
    %cst_6 = arith.constant dense<0.000000e+00> : vector<8xf32>
    %9 = vector.multi_reduction <add>, %8, %cst_6 [1] : vector<8x32xf32> to vector<8xf32>
    %10 = vector.shape_cast %9 : vector<8xf32> to vector<8x1xf32>
    %11 = vector.shape_cast %7 : vector<8x1xf32> to vector<1x8xf32>
    %12 = vector.shape_cast %10 : vector<8x1xf32> to vector<1x8xf32>
    %13 = vector.broadcast %7 : vector<8x1xf32> to vector<8x8xf32>
    %14 = vector.broadcast %11 : vector<1x8xf32> to vector<8x8xf32>
    %15 = arith.addf %13, %14 : vector<8x8xf32>
    %cst_7 = arith.constant 2.000000e+00 : f32
    %16 = vector.broadcast %cst_7 : f32 to vector<8x8xf32>
    %17 = arith.mulf %16, %2 : vector<8x8xf32>
    %18 = arith.subf %15, %17 : vector<8x8xf32>
    %cst_8 = arith.constant 0.000000e+00 : f32
    %19 = vector.broadcast %cst_8 : f32 to vector<8x8xf32>
    %20 = arith.maximumf %18, %19 : vector<8x8xf32>
    %21 = vector.broadcast %7 : vector<8x1xf32> to vector<8x8xf32>
    %22 = vector.broadcast %12 : vector<1x8xf32> to vector<8x8xf32>
    %23 = arith.addf %21, %22 : vector<8x8xf32>
    %cst_9 = arith.constant 2.000000e+00 : f32
    %24 = vector.broadcast %cst_9 : f32 to vector<8x8xf32>
    %25 = arith.mulf %24, %3 : vector<8x8xf32>
    %26 = arith.subf %23, %25 : vector<8x8xf32>
    %cst_10 = arith.constant 0.000000e+00 : f32
    %27 = vector.broadcast %cst_10 : f32 to vector<8x8xf32>
    %28 = arith.maximumf %26, %27 : vector<8x8xf32>
    %29 = vector.broadcast %10 : vector<8x1xf32> to vector<8x8xf32>
    %30 = vector.broadcast %12 : vector<1x8xf32> to vector<8x8xf32>
    %31 = arith.addf %29, %30 : vector<8x8xf32>
    %cst_11 = arith.constant 2.000000e+00 : f32
    %32 = vector.broadcast %cst_11 : f32 to vector<8x8xf32>
    %33 = arith.mulf %32, %4 : vector<8x8xf32>
    %34 = arith.subf %31, %33 : vector<8x8xf32>
    %cst_12 = arith.constant 0.000000e+00 : f32
    %35 = vector.broadcast %cst_12 : f32 to vector<8x8xf32>
    %36 = arith.maximumf %34, %35 : vector<8x8xf32>
    %37 = vector.shape_cast %20 : vector<8x8xf32> to vector<1x8x8xf32>
    %cst_13 = arith.constant dense<0.000000e+00> : vector<1xf32>
    %38 = vector.multi_reduction <add>, %37, %cst_13 [1, 2] : vector<1x8x8xf32> to vector<1xf32>
    %39 = vector.shape_cast %38 : vector<1xf32> to vector<1x1x1xf32>
    %40 = vector.extract %39[0, 0, 0] : f32 from vector<1x1x1xf32>
    %41 = vector.broadcast %40 : f32 to vector<1x1xf32>
    %42 = vector.shape_cast %36 : vector<8x8xf32> to vector<1x8x8xf32>
    %cst_14 = arith.constant dense<0.000000e+00> : vector<1xf32>
    %43 = vector.multi_reduction <add>, %42, %cst_14 [1, 2] : vector<1x8x8xf32> to vector<1xf32>
    %44 = vector.shape_cast %43 : vector<1xf32> to vector<1x1x1xf32>
    %45 = vector.extract %44[0, 0, 0] : f32 from vector<1x1x1xf32>
    %46 = vector.broadcast %45 : f32 to vector<1x1xf32>
    %47 = arith.addf %41, %46 : vector<1x1xf32>
    %48 = vector.shape_cast %28 : vector<8x8xf32> to vector<1x8x8xf32>
    %cst_15 = arith.constant dense<0.000000e+00> : vector<1xf32>
    %49 = vector.multi_reduction <add>, %48, %cst_15 [1, 2] : vector<1x8x8xf32> to vector<1xf32>
    %50 = vector.shape_cast %49 : vector<1xf32> to vector<1x1x1xf32>
    %51 = vector.extract %50[0, 0, 0] : f32 from vector<1x1x1xf32>
    %52 = vector.broadcast %51 : f32 to vector<1x1xf32>
    %cst_16 = arith.constant 2.000000e+00 : f32
    %53 = vector.broadcast %cst_16 : f32 to vector<1x1xf32>
    %54 = arith.mulf %53, %52 : vector<1x1xf32>
    %55 = arith.addf %47, %54 : vector<1x1xf32>
    %cst_17 = arith.constant 0.00416666688 : f32
    %56 = vector.broadcast %cst_17 : f32 to vector<1x1xf32>
    %57 = arith.mulf %55, %56 : vector<1x1xf32>
    %cst_18 = arith.constant 2.500000e-01 : f32
    %58 = vector.broadcast %cst_18 : f32 to vector<1x1xf32>
    %59 = arith.mulf %57, %58 : vector<1x1xf32>
    %cst_19 = arith.constant 1.600000e+01 : f32
    %60 = vector.broadcast %cst_19 : f32 to vector<1x1xf32>
    %61 = arith.mulf %59, %60 : vector<1x1xf32>
    %cst_20 = arith.constant -1.000000e+00 : f32
    %62 = vector.broadcast %cst_20 : f32 to vector<1x1xf32>
    %63 = arith.divf %62, %61 : vector<1x1xf32>
    %64 = vector.broadcast %63 : vector<1x1xf32> to vector<8x8xf32>
    %65 = arith.mulf %20, %64 : vector<8x8xf32>
    %66 = math.exp %65 : vector<8x8xf32>
    %67 = arith.mulf %66, %66 : vector<8x8xf32>
    %68 = arith.addf %66, %67 : vector<8x8xf32>
    %69 = arith.mulf %67, %67 : vector<8x8xf32>
    %70 = arith.addf %68, %69 : vector<8x8xf32>
    %71 = arith.mulf %69, %69 : vector<8x8xf32>
    %72 = arith.addf %70, %71 : vector<8x8xf32>
    %73 = arith.mulf %71, %71 : vector<8x8xf32>
    %74 = arith.addf %72, %73 : vector<8x8xf32>
    %75 = vector.shape_cast %74 : vector<8x8xf32> to vector<1x8x8xf32>
    %cst_21 = arith.constant dense<0.000000e+00> : vector<1xf32>
    %76 = vector.multi_reduction <add>, %75, %cst_21 [1, 2] : vector<1x8x8xf32> to vector<1xf32>
    %77 = vector.shape_cast %76 : vector<1xf32> to vector<1x1x1xf32>
    %78 = vector.extract %77[0, 0, 0] : f32 from vector<1x1x1xf32>
    %79 = vector.broadcast %78 : f32 to vector<1x1xf32>
    %80 = vector.broadcast %63 : vector<1x1xf32> to vector<8x8xf32>
    %81 = arith.mulf %36, %80 : vector<8x8xf32>
    %82 = math.exp %81 : vector<8x8xf32>
    %83 = arith.mulf %82, %82 : vector<8x8xf32>
    %84 = arith.addf %82, %83 : vector<8x8xf32>
    %85 = arith.mulf %83, %83 : vector<8x8xf32>
    %86 = arith.addf %84, %85 : vector<8x8xf32>
    %87 = arith.mulf %85, %85 : vector<8x8xf32>
    %88 = arith.addf %86, %87 : vector<8x8xf32>
    %89 = arith.mulf %87, %87 : vector<8x8xf32>
    %90 = arith.addf %88, %89 : vector<8x8xf32>
    %91 = vector.shape_cast %90 : vector<8x8xf32> to vector<1x8x8xf32>
    %cst_22 = arith.constant dense<0.000000e+00> : vector<1xf32>
    %92 = vector.multi_reduction <add>, %91, %cst_22 [1, 2] : vector<1x8x8xf32> to vector<1xf32>
    %93 = vector.shape_cast %92 : vector<1xf32> to vector<1x1x1xf32>
    %94 = vector.extract %93[0, 0, 0] : f32 from vector<1x1x1xf32>
    %95 = vector.broadcast %94 : f32 to vector<1x1xf32>
    %96 = vector.broadcast %63 : vector<1x1xf32> to vector<8x8xf32>
    %97 = arith.mulf %28, %96 : vector<8x8xf32>
    %98 = math.exp %97 : vector<8x8xf32>
    %99 = arith.mulf %98, %98 : vector<8x8xf32>
    %100 = arith.addf %98, %99 : vector<8x8xf32>
    %101 = arith.mulf %99, %99 : vector<8x8xf32>
    %102 = arith.addf %100, %101 : vector<8x8xf32>
    %103 = arith.mulf %101, %101 : vector<8x8xf32>
    %104 = arith.addf %102, %103 : vector<8x8xf32>
    %105 = arith.mulf %103, %103 : vector<8x8xf32>
    %106 = arith.addf %104, %105 : vector<8x8xf32>
    %107 = vector.shape_cast %106 : vector<8x8xf32> to vector<1x8x8xf32>
    %cst_23 = arith.constant dense<0.000000e+00> : vector<1xf32>
    %108 = vector.multi_reduction <add>, %107, %cst_23 [1, 2] : vector<1x8x8xf32> to vector<1xf32>
    %109 = vector.shape_cast %108 : vector<1xf32> to vector<1x1x1xf32>
    %110 = vector.extract %109[0, 0, 0] : f32 from vector<1x1x1xf32>
    %111 = vector.broadcast %110 : f32 to vector<1x1xf32>
    %112 = arith.addf %79, %95 : vector<1x1xf32>
    %cst_24 = arith.constant 2.000000e+00 : f32
    %113 = vector.broadcast %cst_24 : f32 to vector<1x1xf32>
    %114 = arith.mulf %113, %111 : vector<1x1xf32>
    %115 = arith.subf %112, %114 : vector<1x1xf32>
    %cst_25 = arith.constant 1.562500e-02 : f32
    %116 = vector.broadcast %cst_25 : f32 to vector<1x1xf32>
    %117 = arith.mulf %115, %116 : vector<1x1xf32>
    %c0_26 = arith.constant 0 : index
    %c0_27 = arith.constant 0 : index
    %118 = vector.load %arg2[%c0_26, %c0_27] : memref<1x1xf32, #tpu.memory_space<vmem>>, vector<1x1xf32>
    tpu.vector_store %arg2[%c0_26, %c0_27], %117 {strides = array<i32>} : memref<1x1xf32, #tpu.memory_space<vmem>>, vector<1x1xf32>,
    return
  }
}

</mosaic_0001>

<bundles_post_ra>
// kernel: tpu_custom_call.1
= control target key start
LH: loop header
LB: loop body
LE: loop exit
PB: predicated region body
PF: predicated region fallthrough
CT: control target
= control target key end

     0   :  { %7 = vsyncpa [#allocation3], 0  ;;  %s448_s0 = inlined_call_operand.hbm [shape: f32[8,32], index: 0, kind: input, shape index: {}]   ;;  %s449_s1 = inlined_call_operand.hbm [shape: f32[8,32], index: 1, kind: input, shape index: {}]   ;;  %s450_s2 = inlined_call_operand.hbm [shape: f32[1,1], index: 2, kind: output, shape index: {}]  }
   0x1   :  { %8 = vsyncpa [#allocation6], 0 }
   0x2   :  { %9 = vsyncpa [#allocation4], 0  ;;  %s15_s11 = sshll.u32 %s448_s0, 4  ;;  %s407_s12 = smov [#allocation2]   ;;  %s16_s11 = int_to_ptr.hbm [resolvable:$true] %s15_s11 }
   0x3   :  { %s17_s13 = sshll.u32 %s407_s12, 4  ;;  %s26_s16 = sshll.u32 %s449_s1, 4  ;;  %s18_s13 = int_to_ptr.vmem [resolvable:$true] %s17_s13  ;;  %s27_s16 = int_to_ptr.hbm [resolvable:$true] %s26_s16 }
   0x4   :  { %20 = dma.hbm_to_vmem [thread:$0]  %s16_s11, 128, %s18_s13, [#allocation3]  }
   0x5   :  { %s408_s17 = smov [#allocation5]  }
   0x6   :  { %s28_s18 = sshll.u32 %s408_s17, 4  ;;  %s29_s18 = int_to_ptr.vmem [resolvable:$true] %s28_s18 }
   0x7   :  { %31 = dma.hbm_to_vmem [thread:$0]  %s27_s16, 128, %s29_s18, [#allocation6]  }
   0x8   :  { %401 = dma.done.wait [#allocation3], 128  }
   0x9   :  { %402 = vsyncadd [#allocation3], 4294967168 }
   0xa   :  { %403 = dma.done.wait [#allocation6], 128  }
   0xb   :  { %404 = vsyncadd [#allocation6], 4294967168  ;;  %vm42_vm0 = vcmask 261120   ;;  %v40_v0 = vld [vmem:[#allocation2] sm:$0xff]  ;;  %v41_v1 = vld [vmem:[#allocation5] sm:$0xff]  ;;  %v118_v6 = vlaneseq  ;;  %vm155_vm1 = vcmask 64512  }
   0xc   :  { %300 = vmatpush.xpose.msk.msra.mxu0 %vm42_vm0, %v40_v0  ;;  %302 = vmatpush.xpose.msk.msra.mxu1 %vm42_vm0, %v41_v1  ;;  %v109_v2 = vmul.f32 %v40_v0, %v40_v0  ;;  %v113_v4 = vmul.f32 %v41_v1, %v41_v1  ;;  %s409_s23 = smov [#allocation7]   ;;  %s289_s27 = sshll.u32 %s450_s2, 4  ;;  %vm280_vm6 = vcmask 0   ;;  %s290_s27 = int_to_ptr.hbm [resolvable:$true] %s289_s27 }
   0xd   :  { %304 = vmatpush.xpose.msk.msra.mxu2 %vm42_vm0, %v41_v1  ;;  %v119_v8 = vand.u32 127, %v118_v6  ;;  %s287_s24 = sshll.u32 %s409_s23, 4  ;;  %s288_s24 = int_to_ptr.vmem [resolvable:$true] %s287_s24 }
   0xe   :  { %v110_v3 = vsel %vm42_vm0, %v109_v2, 0.0  ;;  %v114_v5 = vsel %vm42_vm0, %v113_v4, 0.0 }
   0xf   :  { %111 = vadd.xlane.f32.xlu0 %v110_v3  ;;  %301 = vmatmul.msk.f32.vlgmr.msra.gmra.mxu0 %vm42_vm0, %v40_v0 }
  0x10   :  { %305 = vmatmul.msk.f32.vlgmr.msra.gmra.mxu2 %vm42_vm0, %v41_v1  ;;  %303 = vmatmul.msk.f32.vlgmr.msra.gmra.mxu1 %vm42_vm0, %v40_v0 }
  0x17   :  { %115 = vadd.xlane.f32.xlu0 %v114_v5 }
  0x82   :  { %v112_v7 = vpop.xlane.xlu0 %111 }
  0x83   :  { %v120_v9 = vperm.slane %v112_v7, %v119_v8 }
  0x85   :  { %v134_v13 = vadd.f32 %v120_v9, %v112_v7 }
  0x8a   :  { %v116_v10 = vpop.xlane.xlu0 %115 }
  0x8b   :  { %v139_v11 = vperm.slane %v116_v10, %v119_v8 }
  0x8c   :  { %v63_v12 = vpop.f32.mrf.mxu0 }
  0x8d   :  { %v135_v14 = vmul.f32 2.0, %v63_v12  ;;  %v86_v15 = vpop.f32.mrf.mxu1  ;;  %v147_v16 = vadd.f32 %v139_v11, %v112_v7  ;;  %v151_v21 = vadd.f32 %v139_v11, %v116_v10 }
  0x8e   :  { %v148_v17 = vmul.f32 2.0, %v86_v15 }
  0x8f   :  { %v136_v18 = vsub.f32 %v134_v13, %v135_v14 }
  0x90   :  { %v149_v19 = vsub.f32 %v147_v16, %v148_v17 }
  0x91   :  { %v431_v20 = vmax.f32 %v136_v18, 0.0 }
  0x92   :  { %v433_v22 = vmax.f32 %v149_v19, 0.0 }
  0x93   :  { %v106_v23 = vpop.f32.mrf.mxu2  ;;  %v156_v24 = vsel %vm155_vm1, %v431_v20, 0.0 }
  0x94   :  { %v152_v25 = vmul.f32 2.0, %v106_v23  ;;  %v179_v26 = vsel %vm155_vm1, %v433_v22, 0.0  ;;  %157 = vadd.xlane.f32.xlu1 %v156_v24 }
  0x95   :  { %180 = vadd.xlane.f32.xlu2 %v179_v26 }
  0x96   :  { %v153_v27 = vsub.f32 %v151_v21, %v152_v25 }
  0x98   :  { %v154_v28 = vmax.f32 %v153_v27, 0.0 }
  0x9a   :  { %v167_v29 = vsel %vm155_vm1, %v154_v28, 0.0 }
  0x9c   :  { %168 = vadd.xlane.f32.xlu1 %v167_v29 }
 0x107   :  { %v158_v30 = vpop.xlane.xlu1 %157 }
 0x108   :  { %v181_v31 = vpop.xlane.xlu2 %180  ;;  %v159_v32 = vrot.slane %v158_v30, 4 }
 0x109   :  { %v182_v33 = vrot.slane %v181_v31, 4 }
 0x10a   :  { %v160_v34 = vadd.f32 %v159_v32, %v158_v30 }
 0x10b   :  { %v183_v35 = vadd.f32 %v182_v33, %v181_v31 }
 0x10c   :  { %v161_v36 = vrot.slane %v160_v34, 2 }
 0x10d   :  { %v184_v38 = vrot.slane %v183_v35, 2 }
 0x10e   :  { %v162_v37 = vadd.f32 %v161_v36, %v160_v34 }
 0x10f   :  { %v169_v39 = vpop.xlane.xlu1 %168  ;;  %v185_v44 = vadd.f32 %v184_v38, %v183_v35 }
 0x110   :  { %v170_v40 = vrot.slane %v169_v39, 4  ;;  %v163_v41 = vrot.slane %v162_v37, 1 }
 0x111   :  { %v186_v47 = vrot.slane %v185_v44, 1 }
 0x112   :  { %v171_v42 = vadd.f32 %v170_v40, %v169_v39  ;;  %v164_v43 = vadd.f32 %v163_v41, %v162_v37 }
 0x113   :  { %v187_v50 = vadd.f32 %v186_v47, %v185_v44 }
 0x114   :  { %v172_v45 = vrot.slane %v171_v42, 2  ;;  %306 = vpush %v164_v43 }
 0x116   :  { %v173_v46 = vadd.f32 %v172_v45, %v171_v42 }
 0x118   :  { %v174_v48 = vrot.slane %v173_v46, 1 }
 0x11a   :  { %v175_v49 = vadd.f32 %v174_v48, %v173_v46 }
 0x11c   :  { %308 = vpush %v175_v49 }
 0x11d   :  { %310 = vpush %v187_v50 }
 0x145   :  { %s307_s0 = spop %306 }
 0x146   :  { %v166_v51 = vstv %s307_s0 }
 0x14d   :  { %s309_s1 = spop %308 }
 0x14e   :  { %v177_v52 = vstv %s309_s1  ;;  %s311_s19 = spop %310 }
 0x14f   :  { %v178_v53 = vadd.f32 %v177_v52, %v166_v51  ;;  %v189_v54 = vstv %s311_s19 }
 0x150   :  { %v190_v55 = vmul.f32 2.0, %v189_v54 }
 0x152   :  { %v191_v56 = vadd.f32 %v190_v55, %v178_v53 }
 0x154   :  { %v192_v57 = vmul.f32 0.004166667, %v191_v56 }
 0x156   :  { %v193_v58 = vmul.f32 0.25, %v192_v57 }
 0x158   :  { %v194_v59 = vmul.f32 16.0, %v193_v58 }
 0x15a   :  { %321 = vrcp.f32 %v194_v59  ;;  %v206_v63 = vand.u32 2147483648, %v194_v59  ;;  %v204_v1 = vand.u32 2147483647, %v194_v59  ;;  %vm200_vm3 = vweird.f32 %v194_v59 }
 0x15c   :  { %v207_v3 = vor.u32 1.1754944e-38, %v206_v63  ;;  %vm205_vm5 = vcmp.eq.f32.partialorder %v204_v1, 8.507059e+37 }
 0x160   :  { %v322_v60 = vpop.eup %321 }
 0x161   :  { %v196_v61 = vmul.f32 %v322_v60, %v194_v59  ;;  %vm201_vm2 = vweird.f32 %v322_v60 }
 0x162   :  { %vm202_vm4 = vmor %vm200_vm3, %vm201_vm2 }
 0x163   :  { %v197_v62 = vsub.f32 1.0, %v196_v61 }
 0x165   :  { %v198_v0 = vmul.f32 %v322_v60, %v197_v62 }
 0x167   :  { %v199_v2 = vadd.f32 %v322_v60, %v198_v0 }
 0x169   :  { %v203_v4 = vsel %vm202_vm4, %v322_v60, %v199_v2 }
 0x16a   :  { %v208_v5 = vsel %vm205_vm5, %v207_v3, %v203_v4 }
 0x16b   :  { %v209_v6 = vmul.f32 -1.0, %v208_v5 }
 0x16d   :  { %v254_v7 = vmul.f32 %v209_v6, %v433_v22  ;;  %v232_v8 = vmul.f32 %v209_v6, %v154_v28  ;;  %v210_v9 = vmul.f32 %v209_v6, %v431_v20 }
 0x16f   :  { %v255_v10 = vmul.f32 1.442695, %v254_v7  ;;  %v233_v11 = vmul.f32 1.442695, %v232_v8  ;;  %v211_v12 = vmul.f32 1.442695, %v210_v9 }
 0x171   :  { %323 = vpow2.f32 %v255_v10 }
 0x172   :  { %325 = vpow2.f32 %v233_v11 }
 0x173   :  { %327 = vpow2.f32 %v211_v12 }
 0x177   :  { %v324_v13 = vpop.eup %323 }
 0x178   :  { %v326_v14 = vpop.eup %325  ;;  %v257_v15 = vmul.f32 %v324_v13, %v324_v13 }
 0x179   :  { %v328_v16 = vpop.eup %327  ;;  %v235_v17 = vmul.f32 %v326_v14, %v326_v14 }
 0x17a   :  { %v258_v18 = vadd.f32 %v324_v13, %v257_v15  ;;  %v259_v19 = vmul.f32 %v257_v15, %v257_v15  ;;  %v213_v21 = vmul.f32 %v328_v16, %v328_v16 }
 0x17b   :  { %v236_v23 = vadd.f32 %v326_v14, %v235_v17  ;;  %v237_v24 = vmul.f32 %v235_v17, %v235_v17 }
 0x17c   :  { %v260_v22 = vadd.f32 %v259_v19, %v258_v18  ;;  %v261_v25 = vmul.f32 %v259_v19, %v259_v19  ;;  %v214_v26 = vadd.f32 %v328_v16, %v213_v21  ;;  %v215_v20 = vmul.f32 %v213_v21, %v213_v21 }
 0x17d   :  { %v238_v27 = vadd.f32 %v237_v24, %v236_v23  ;;  %v239_v28 = vmul.f32 %v237_v24, %v237_v24 }
 0x17e   :  { %v262_v29 = vadd.f32 %v261_v25, %v260_v22  ;;  %v263_v30 = vmul.f32 %v261_v25, %v261_v25  ;;  %v216_v31 = vadd.f32 %v215_v20, %v214_v26  ;;  %v217_v32 = vmul.f32 %v215_v20, %v215_v20 }
 0x17f   :  { %v240_v33 = vadd.f32 %v239_v28, %v238_v27  ;;  %v241_v34 = vmul.f32 %v239_v28, %v239_v28 }
 0x180   :  { %v264_v35 = vadd.f32 %v263_v30, %v262_v29  ;;  %v218_v36 = vadd.f32 %v217_v32, %v216_v31  ;;  %v219_v37 = vmul.f32 %v217_v32, %v217_v32 }
 0x181   :  { %v242_v38 = vadd.f32 %v241_v34, %v240_v33 }
 0x182   :  { %v265_v39 = vsel %vm155_vm1, %v264_v35, 0.0  ;;  %v220_v40 = vadd.f32 %v219_v37, %v218_v36 }
 0x183   :  { %266 = vadd.xlane.f32.xlu1 %v265_v39  ;;  %v243_v41 = vsel %vm155_vm1, %v242_v38, 0.0 }
 0x184   :  { %244 = vadd.xlane.f32.xlu0 %v243_v41  ;;  %v221_v42 = vsel %vm155_vm1, %v220_v40, 0.0 }
 0x185   :  { %222 = vadd.xlane.f32.xlu2 %v221_v42 }
 0x1f6   :  { %v267_v43 = vpop.xlane.xlu1 %266 }
 0x1f7   :  { %v268_v44 = vrot.slane %v267_v43, 4  ;;  %v245_v45 = vpop.xlane.xlu0 %244 }
 0x1f8   :  { %v246_v46 = vrot.slane %v245_v45, 4  ;;  %v223_v47 = vpop.xlane.xlu2 %222 }
 0x1f9   :  { %v269_v48 = vadd.f32 %v268_v44, %v267_v43  ;;  %v224_v49 = vrot.slane %v223_v47, 4 }
 0x1fa   :  { %v247_v50 = vadd.f32 %v246_v46, %v245_v45 }
 0x1fb   :  { %v270_v51 = vrot.slane %v269_v48, 2  ;;  %v225_v52 = vadd.f32 %v224_v49, %v223_v47 }
 0x1fc   :  { %v248_v53 = vrot.slane %v247_v50, 2 }
 0x1fd   :  { %v271_v54 = vadd.f32 %v270_v51, %v269_v48  ;;  %v226_v55 = vrot.slane %v225_v52, 2 }
 0x1fe   :  { %v249_v56 = vadd.f32 %v248_v53, %v247_v50 }
 0x1ff   :  { %v227_v57 = vadd.f32 %v226_v55, %v225_v52  ;;  %v272_v58 = vrot.slane %v271_v54, 1 }
 0x200   :  { %v250_v59 = vrot.slane %v249_v56, 1 }
 0x201   :  { %v228_v60 = vrot.slane %v227_v57, 1  ;;  %v273_v63 = vadd.f32 %v272_v58, %v271_v54 }
 0x202   :  { %v251_v61 = vadd.f32 %v250_v59, %v249_v56 }
 0x203   :  { %v229_v62 = vadd.f32 %v228_v60, %v227_v57 }
 0x205   :  { %312 = vpush %v229_v62 }
 0x206   :  { %314 = vpush %v251_v61 }
 0x207   :  { %316 = vpush %v273_v63 }
 0x236   :  { %s313_s20 = spop %312 }
 0x237   :  { %v231_v0 = vstv %s313_s20  ;;  %s315_s21 = spop %314 }
 0x238   :  { %v253_v1 = vstv %s315_s21  ;;  %s317_s22 = spop %316 }
 0x239   :  { %v276_v2 = vadd.f32 %v253_v1, %v231_v0  ;;  %v275_v3 = vstv %s317_s22 }
 0x23a   :  { %v277_v4 = vmul.f32 2.0, %v275_v3 }
 0x23c   :  { %v278_v5 = vsub.f32 %v276_v2, %v277_v4 }
 0x23e   :  { %v279_v6 = vmul.f32 0.015625, %v278_v5 }
 0x240   :  { %281 = vst.msk [vmem:[#allocation7] sm:$0x1] %vm280_vm6, %v279_v6 }
 0x241   :  { %292 = dma.vmem_to_hbm [thread:$0]  %s288_s24, 16, %s290_s27, [#allocation4]  }
 0x242   :  { %405 = dma.done.wait [#allocation4], 16  }
 0x243   :  { %406 = vsyncadd [#allocation4], 4294967280 }
 0x244   :  { %297 = vsyncpa [#allocation3], 1 }
 0x245   :  { %298 = vsyncpa [#allocation6], 1 }
 0x246   :  { %299 = vsyncpa [#allocation4], 1 }

</bundles_post_ra>
